<compile_context>
chip_gen: v7x
topology: tpu7x:2x2x1
jax: 0.10.0
libtpu: 0.0.40
codegen_flags: <defaults>
</compile_context>

<pallas_src>
import numpy as np
import jax
import jax.numpy as jnp
from jax import lax
from jax.experimental import pallas as pl
from jax.experimental.pallas import tpu as pltpu


def _pick_batch_block(batch, per_batch_bytes, budget_bytes=4 << 20):
    """Largest divisor of `batch` whose x tile stays under ~4 MiB.

    Conservative so that 2x double-buffered x tiles + resident weight +
    logits scratch fit comfortably inside v7x's smaller scoped VMEM.
    """
    cap = max(1, budget_bytes // max(per_batch_bytes, 1))
    bb = 1
    for d in range(1, batch + 1):
        if batch % d == 0 and d <= cap:
            bb = d
    return bb


def class_predictor(x, weight, label):
    """Returns (loss / batch_size, acc / num) as two float32 scalars.

    x:      (B, num_classes, representation_size)
    weight: (num_classes, representation_size)  -- squeezed 1x1 conv, no bias
    label:  (B, num_classes) multi-hot (label > 0 marks positive classes)
    """
    B, C, R = x.shape
    assert weight.shape == (C, R)
    assert label.shape == (B, C)

    # Lane-dense class axis: transpose + zero-pad the weight to (R, Cp), Cp % 128 == 0.
    Cp = max(128, ((C + 127) // 128) * 128)
    wt_pad = jnp.pad(jnp.transpose(weight), ((0, 0), (0, Cp - C)))   # (R, Cp)
    label3 = label.reshape(B, 1, C)      # last two block dims == full dims (layout-safe)

    bb = _pick_batch_block(B, C * R * x.dtype.itemsize)
    nsteps = B // bb

    def kernel(x_ref, wt_ref, label_ref, out_ref, acc_ref):
        step = pl.program_id(0)

        @pl.when(step == 0)
        def _init():
            acc_ref[0] = jnp.float32(0.0)   # sum over batches of per-batch mean CE
            acc_ref[1] = jnp.float32(0.0)   # number of correct positive rows
            acc_ref[2] = jnp.float32(0.0)   # number of positive rows

        # One 2-D MXU matmul per step: (bb*C, R) @ (R, Cp) -> f32 (bb*C, Cp).
        x2d = x_ref[...].reshape(bb * C, R)              # free view (merge leading dims)
        logits = jnp.dot(x2d, wt_ref[...], preferred_element_type=jnp.float32)

        # Column iota is needed anyway to mask the padded class columns; reuse it
        # to extract the target (diagonal) logit instead of a second iota cube.
        col = lax.broadcasted_iota(jnp.int32, (bb * C, Cp), 1)
        cls = lax.broadcasted_iota(jnp.int32, (bb, C, 1), 1).reshape(bb * C, 1)
        logits = jnp.where(col < C, logits, jnp.float32(-1e30))

        m = jnp.max(logits, axis=-1, keepdims=True)                        # (bb*C, 1)
        lse = m + jnp.log(jnp.sum(jnp.exp(logits - m), axis=-1, keepdims=True))
        tgt = jnp.sum(jnp.where(col == cls, logits, 0.0), axis=-1, keepdims=True)
        ce = lse - tgt                                                     # (bb*C, 1)
        correct = (tgt >= m).astype(jnp.float32)       # target logit is the row max

        maskf = (label_ref[...] > 0).astype(jnp.float32).reshape(bb, C)    # (bb, C)
        ce2 = ce.reshape(bb, C)
        cor2 = correct.reshape(bb, C)

        k_b = jnp.sum(maskf, axis=-1, keepdims=True)                       # (bb, 1)
        loss_b = jnp.sum(maskf * ce2, axis=-1, keepdims=True) / jnp.maximum(k_b, 1.0)

        acc_ref[0] += jnp.sum(loss_b)
        acc_ref[1] += jnp.sum(maskf * cor2)
        acc_ref[2] += jnp.sum(maskf)

        @pl.when(step == nsteps - 1)
        def _fin():
            out_ref[0] = acc_ref[0] / jnp.float32(B)
            # Guard num == 0 (reference would divide by zero); otherwise identical.
            out_ref[1] = acc_ref[1] / jnp.maximum(acc_ref[2], jnp.float32(1.0))

    cost = pl.CostEstimate(
        flops=2 * B * C * R * Cp,
        transcendentals=B * C * Cp + 2 * B * C,
        bytes_accessed=(x.size * x.dtype.itemsize
                        + wt_pad.size * wt_pad.dtype.itemsize
                        + label.size * label.dtype.itemsize + 2 * 4),
    )

    out = pl.pallas_call(
        kernel,
        out_shape=jax.ShapeDtypeStruct((2,), jnp.float32),
        grid_spec=pltpu.PrefetchScalarGridSpec(
            num_scalar_prefetch=0,
            grid=(nsteps,),
            in_specs=[
                pl.BlockSpec((bb, C, R), lambda i: (i, 0, 0)),   # pipelined x tiles
                pl.BlockSpec((R, Cp), lambda i: (0, 0)),         # resident weight
                pl.BlockSpec((bb, 1, C), lambda i: (i, 0, 0)),   # pipelined labels
            ],
            out_specs=pl.BlockSpec(memory_space=pltpu.MemorySpace.SMEM),
            scratch_shapes=[pltpu.SMEM((3,), jnp.float32)],
        ),
        compiler_params=pltpu.CompilerParams(
            # The single grid axis carries the loss/acc/num accumulator -> sequential.
            dimension_semantics=("arbitrary",),
        ),
        cost_estimate=cost,
    )(x, wt_pad, label3)
    return out[0], out[1]


def ref_numpy(x, w, label):
    """Pure-numpy replica of the PyTorch forward for verification."""
    x = np.asarray(x, np.float32)
    w = np.asarray(w, np.float32)
    label = np.asarray(label, np.float32)
    B, C, R = x.shape
    loss, acc, num = 0.0, 0.0, 0
    for b in range(B):
        idx = np.nonzero(label[b] > 0)[0]
        if idx.size == 0:
            continue
        feats = x[b][idx]                     # (k, R)
        logit = feats @ w.T                   # (k, C)
        m = logit.max(-1, keepdims=True)
        lse = m[:, 0] + np.log(np.exp(logit - m).sum(-1))
        ce = lse - logit[np.arange(idx.size), idx]
        loss += ce.mean()
        acc += float((logit.argmax(-1) == idx).sum())
        num += idx.size
    return loss / B, acc / num


if __name__ == "__main__":
    B, num_classes, rep_size = 2, 8, 32

    key = jax.random.PRNGKey(0)
    kx, kw, kl = jax.random.split(key, 3)

    x = jax.random.normal(kx, (B, num_classes, rep_size), dtype=jnp.float32)
    # deterministic synthetic classifier weight (Conv2d 1x1, no bias) squeezed to (C, R)
    weight = 0.1 * jax.random.normal(kw, (num_classes, rep_size), dtype=jnp.float32)
    # multi-hot labels, guarantee at least one positive per batch element
    label = (jax.random.uniform(kl, (B, num_classes)) > 0.5).astype(jnp.float32)
    label = label.at[:, 0].set(1.0)

    loss, acc = class_predictor(x, weight, label)
    loss, acc = jax.block_until_ready((loss, acc))

    ref_loss, ref_acc = ref_numpy(x, weight, label)
    np.testing.assert_allclose(np.asarray(loss), ref_loss, rtol=1e-4, atol=1e-5)
    np.testing.assert_allclose(np.asarray(acc), ref_acc, rtol=1e-5, atol=1e-6)

    print("KERNEL_OK")
</pallas_src>

<mosaic_0001>
module attributes {stable_mosaic.version = 11 : i64} {
  func.func @kernel(%arg0: i32, %arg1: memref<2x8x32xf32, #tpu.memory_space<vmem>>, %arg2: memref<32x128xf32, #tpu.memory_space<vmem>>, %arg3: memref<2x1x8xf32, #tpu.memory_space<vmem>>, %arg4: memref<2xf32, #tpu.memory_space<smem>>, %arg5: memref<3xf32, #tpu.memory_space<smem>>) attributes {dimension_semantics = [#tpu.dimension_semantics<arbitrary>], iteration_bounds = array<i64: 1>, scalar_prefetch = 0 : i64, scratch_operands = 1 : i64, tpu.core_type = #tpu.core_type<tc>, window_params = [{transform_indices = @transform_0, window_bounds = array<i64: 2, 8, 32>}, {pipeline_mode = #tpu.pipeline_mode<synchronous>, transform_indices = @transform_1, window_bounds = array<i64: 32, 128>}, {transform_indices = @transform_2, window_bounds = array<i64: 2, 1, 8>}, {transform_indices = @transform_3, window_bounds = array<i64: 2>}]} {
    %c0_i32 = arith.constant 0 : i32
    %0 = arith.cmpi eq, %arg0, %c0_i32 : i32
    %1 = arith.extui %0 : i1 to i32
    %c0_i32_0 = arith.constant 0 : i32
    %2 = arith.cmpi ne, %1, %c0_i32_0 : i32
    scf.if %2 {
      %cst_26 = arith.constant 0.000000e+00 : f32
      %c0_27 = arith.constant 0 : index
      %74 = memref.load %arg5[%c0_27] : memref<3xf32, #tpu.memory_space<smem>>
      memref.store %cst_26, %arg5[%c0_27] : memref<3xf32, #tpu.memory_space<smem>>
      %cst_28 = arith.constant 0.000000e+00 : f32
      %c1_29 = arith.constant 1 : index
      %75 = memref.load %arg5[%c1_29] : memref<3xf32, #tpu.memory_space<smem>>
      memref.store %cst_28, %arg5[%c1_29] : memref<3xf32, #tpu.memory_space<smem>>
      %cst_30 = arith.constant 0.000000e+00 : f32
      %c2_31 = arith.constant 2 : index
      %76 = memref.load %arg5[%c2_31] : memref<3xf32, #tpu.memory_space<smem>>
      memref.store %cst_30, %arg5[%c2_31] : memref<3xf32, #tpu.memory_space<smem>>
    } else {
    }
    %c0 = arith.constant 0 : index
    %c0_1 = arith.constant 0 : index
    %c0_2 = arith.constant 0 : index
    %3 = vector.load %arg1[%c0, %c0_1, %c0_2] : memref<2x8x32xf32, #tpu.memory_space<vmem>>, vector<2x8x32xf32>
    %4 = vector.shape_cast %3 : vector<2x8x32xf32> to vector<16x32xf32>
    %c0_3 = arith.constant 0 : index
    %c0_4 = arith.constant 0 : index
    %5 = vector.load %arg2[%c0_3, %c0_4] : memref<32x128xf32, #tpu.memory_space<vmem>>, vector<32x128xf32>
    %cst = arith.constant dense<0.000000e+00> : vector<16x128xf32>
    %6 = tpu.matmul %4, %5, %cst {dimension_numbers = #tpu.dot_dimension_numbers<[1], [0], [0], [1], [0, 0, 1, 1], [], []>} : vector<16x32xf32>, vector<32x128xf32>, vector<16x128xf32> -> vector<16x128xf32>
    %7 = tpu.iota {dimensions = array<i32: 1>} : vector<16x128xi32>
    %8 = tpu.iota {dimensions = array<i32: 1>} : vector<2x8x1xi32>
    %9 = vector.shape_cast %8 : vector<2x8x1xi32> to vector<16x1xi32>
    %c8_i32 = arith.constant 8 : i32
    %10 = vector.broadcast %c8_i32 : i32 to vector<16x128xi32>
    %11 = arith.cmpi slt, %7, %10 : vector<16x128xi32>
    %cst_5 = arith.constant -1.000000e+30 : f32
    %12 = vector.broadcast %cst_5 : f32 to vector<16x128xf32>
    %13 = arith.select %11, %6, %12 : vector<16x128xi1>, vector<16x128xf32>
    %cst_6 = arith.constant dense<0xFF800000> : vector<16xf32>
    %14 = vector.multi_reduction <maximumf>, %13, %cst_6 [1] : vector<16x128xf32> to vector<16xf32>
    %15 = vector.shape_cast %14 : vector<16xf32> to vector<16x1xf32>
    %16 = vector.broadcast %15 : vector<16x1xf32> to vector<16x128xf32>
    %17 = arith.subf %13, %16 : vector<16x128xf32>
    %18 = math.exp %17 : vector<16x128xf32>
    %cst_7 = arith.constant dense<0.000000e+00> : vector<16xf32>
    %19 = vector.multi_reduction <add>, %18, %cst_7 [1] : vector<16x128xf32> to vector<16xf32>
    %20 = vector.shape_cast %19 : vector<16xf32> to vector<16x1xf32>
    %21 = math.log %20 : vector<16x1xf32>
    %22 = arith.addf %15, %21 : vector<16x1xf32>
    %23 = vector.broadcast %9 : vector<16x1xi32> to vector<16x128xi32>
    %24 = arith.cmpi eq, %7, %23 : vector<16x128xi32>
    %cst_8 = arith.constant 0.000000e+00 : f32
    %25 = vector.broadcast %cst_8 : f32 to vector<16x128xf32>
    %26 = arith.select %24, %13, %25 : vector<16x128xi1>, vector<16x128xf32>
    %cst_9 = arith.constant dense<0.000000e+00> : vector<16xf32>
    %27 = vector.multi_reduction <add>, %26, %cst_9 [1] : vector<16x128xf32> to vector<16xf32>
    %28 = vector.shape_cast %27 : vector<16xf32> to vector<16x1xf32>
    %29 = arith.subf %22, %28 : vector<16x1xf32>
    %30 = arith.cmpf oge, %28, %15 : vector<16x1xf32>
    %31 = arith.extui %30 : vector<16x1xi1> to vector<16x1xi32>
    %32 = arith.sitofp %31 : vector<16x1xi32> to vector<16x1xf32>
    %c0_10 = arith.constant 0 : index
    %c0_11 = arith.constant 0 : index
    %c0_12 = arith.constant 0 : index
    %33 = vector.load %arg3[%c0_10, %c0_11, %c0_12] : memref<2x1x8xf32, #tpu.memory_space<vmem>>, vector<2x1x8xf32>
    %cst_13 = arith.constant 0.000000e+00 : f32
    %34 = vector.broadcast %cst_13 : f32 to vector<2x1x8xf32>
    %35 = arith.cmpf ogt, %33, %34 : vector<2x1x8xf32>
    %36 = arith.extui %35 : vector<2x1x8xi1> to vector<2x1x8xi32>
    %37 = arith.sitofp %36 : vector<2x1x8xi32> to vector<2x1x8xf32>
    %38 = vector.shape_cast %37 : vector<2x1x8xf32> to vector<2x8xf32>
    %39 = vector.shape_cast %29 : vector<16x1xf32> to vector<2x8xf32>
    %40 = vector.shape_cast %32 : vector<16x1xf32> to vector<2x8xf32>
    %cst_14 = arith.constant dense<0.000000e+00> : vector<2xf32>
    %41 = vector.multi_reduction <add>, %38, %cst_14 [1] : vector<2x8xf32> to vector<2xf32>
    %42 = vector.shape_cast %41 : vector<2xf32> to vector<2x1xf32>
    %43 = arith.mulf %38, %39 : vector<2x8xf32>
    %cst_15 = arith.constant dense<0.000000e+00> : vector<2xf32>
    %44 = vector.multi_reduction <add>, %43, %cst_15 [1] : vector<2x8xf32> to vector<2xf32>
    %45 = vector.shape_cast %44 : vector<2xf32> to vector<2x1xf32>
    %cst_16 = arith.constant 1.000000e+00 : f32
    %46 = vector.broadcast %cst_16 : f32 to vector<2x1xf32>
    %47 = arith.maximumf %42, %46 : vector<2x1xf32>
    %48 = arith.divf %45, %47 : vector<2x1xf32>
    %c0_17 = arith.constant 0 : index
    %49 = memref.load %arg5[%c0_17] : memref<3xf32, #tpu.memory_space<smem>>
    %50 = vector.shape_cast %48 : vector<2x1xf32> to vector<1x2x1xf32>
    %cst_18 = arith.constant dense<0.000000e+00> : vector<1xf32>
    %51 = vector.multi_reduction <add>, %50, %cst_18 [1, 2] : vector<1x2x1xf32> to vector<1xf32>
    %52 = vector.shape_cast %51 : vector<1xf32> to vector<1x1x1xf32>
    %53 = vector.extract %52[0, 0, 0] : f32 from vector<1x1x1xf32>
    %54 = arith.addf %49, %53 : f32
    %c0_19 = arith.constant 0 : index
    %55 = memref.load %arg5[%c0_19] : memref<3xf32, #tpu.memory_space<smem>>
    memref.store %54, %arg5[%c0_19] : memref<3xf32, #tpu.memory_space<smem>>
    %c1 = arith.constant 1 : index
    %56 = memref.load %arg5[%c1] : memref<3xf32, #tpu.memory_space<smem>>
    %57 = arith.mulf %38, %40 : vector<2x8xf32>
    %58 = vector.shape_cast %57 : vector<2x8xf32> to vector<1x2x8xf32>
    %cst_20 = arith.constant dense<0.000000e+00> : vector<1xf32>
    %59 = vector.multi_reduction <add>, %58, %cst_20 [1, 2] : vector<1x2x8xf32> to vector<1xf32>
    %60 = vector.shape_cast %59 : vector<1xf32> to vector<1x1x1xf32>
    %61 = vector.extract %60[0, 0, 0] : f32 from vector<1x1x1xf32>
    %62 = arith.addf %56, %61 : f32
    %c1_21 = arith.constant 1 : index
    %63 = memref.load %arg5[%c1_21] : memref<3xf32, #tpu.memory_space<smem>>
    memref.store %62, %arg5[%c1_21] : memref<3xf32, #tpu.memory_space<smem>>
    %c2 = arith.constant 2 : index
    %64 = memref.load %arg5[%c2] : memref<3xf32, #tpu.memory_space<smem>>
    %65 = vector.shape_cast %38 : vector<2x8xf32> to vector<1x2x8xf32>
    %cst_22 = arith.constant dense<0.000000e+00> : vector<1xf32>
    %66 = vector.multi_reduction <add>, %65, %cst_22 [1, 2] : vector<1x2x8xf32> to vector<1xf32>
    %67 = vector.shape_cast %66 : vector<1xf32> to vector<1x1x1xf32>
    %68 = vector.extract %67[0, 0, 0] : f32 from vector<1x1x1xf32>
    %69 = arith.addf %64, %68 : f32
    %c2_23 = arith.constant 2 : index
    %70 = memref.load %arg5[%c2_23] : memref<3xf32, #tpu.memory_space<smem>>
    memref.store %69, %arg5[%c2_23] : memref<3xf32, #tpu.memory_space<smem>>
    %c0_i32_24 = arith.constant 0 : i32
    %71 = arith.cmpi eq, %arg0, %c0_i32_24 : i32
    %72 = arith.extui %71 : i1 to i32
    %c0_i32_25 = arith.constant 0 : i32
    %73 = arith.cmpi ne, %72, %c0_i32_25 : i32
    scf.if %73 {
      %c0_26 = arith.constant 0 : index
      %74 = memref.load %arg5[%c0_26] : memref<3xf32, #tpu.memory_space<smem>>
      %cst_27 = arith.constant 2.000000e+00 : f32
      %75 = arith.divf %74, %cst_27 : f32
      %c0_28 = arith.constant 0 : index
      %76 = memref.load %arg4[%c0_28] : memref<2xf32, #tpu.memory_space<smem>>
      memref.store %75, %arg4[%c0_28] : memref<2xf32, #tpu.memory_space<smem>>
      %c1_29 = arith.constant 1 : index
      %77 = memref.load %arg5[%c1_29] : memref<3xf32, #tpu.memory_space<smem>>
      %c2_30 = arith.constant 2 : index
      %78 = memref.load %arg5[%c2_30] : memref<3xf32, #tpu.memory_space<smem>>
      %cst_31 = arith.constant 1.000000e+00 : f32
      %79 = arith.maximumf %78, %cst_31 : f32
      %80 = arith.divf %77, %79 : f32
      %c1_32 = arith.constant 1 : index
      %81 = memref.load %arg4[%c1_32] : memref<2xf32, #tpu.memory_space<smem>>
      memref.store %80, %arg4[%c1_32] : memref<2xf32, #tpu.memory_space<smem>>
    } else {
    }
    return
  }
  func.func @transform_0(%arg0: i32) -> (i32, i32, i32) {
    %c0_i32 = arith.constant 0 : i32
    %c0_i32_0 = arith.constant 0 : i32
    %c0_i32_1 = arith.constant 0 : i32
    return %arg0, %c0_i32, %c0_i32_0 : i32, i32, i32
  }
  func.func @transform_1(%arg0: i32) -> (i32, i32) {
    %c0_i32 = arith.constant 0 : i32
    %c0_i32_0 = arith.constant 0 : i32
    %c0_i32_1 = arith.constant 0 : i32
    return %c0_i32, %c0_i32_0 : i32, i32
  }
  func.func @transform_2(%arg0: i32) -> (i32, i32, i32) {
    %c0_i32 = arith.constant 0 : i32
    %c0_i32_0 = arith.constant 0 : i32
    %c0_i32_1 = arith.constant 0 : i32
    return %arg0, %c0_i32, %c0_i32_0 : i32, i32, i32
  }
  func.func @transform_3(%arg0: i32) -> i32 {
    %c0_i32 = arith.constant 0 : i32
    %c0_i32_0 = arith.constant 0 : i32
    return %c0_i32 : i32
  }
}

</mosaic_0001>

<bundles_post_ra>
// kernel: tpu_custom_call.1
= control target key start
LH: loop header
LB: loop body
LE: loop exit
PB: predicated region body
PF: predicated region fallthrough
CT: control target
= control target key end

     0   :  { %8 = vsyncpa [#allocation4], 0  ;;  %s1071_s0 = inlined_call_operand.hbm [shape: f32[2,8,32], index: 0, kind: input, shape index: {}]   ;;  %s1072_s1 = inlined_call_operand.hbm [shape: f32[32,128], index: 1, kind: input, shape index: {}]   ;;  %s1073_s2 = inlined_call_operand.vmem [shape: f32[2,1,8], index: 2, kind: input, shape index: {}]   ;;  %s1074_s3 = inlined_call_operand.hbm [shape: f32[2], index: 3, kind: output, shape index: {}]  }
   0x1   :  { %9 = vsyncpa [#allocation7], 0 }
   0x2   :  { %10 = vsyncpa [#allocation5], 0  ;;  %s874_s12 = smov [#allocation3]   ;;  %s814_s16 = scalar_lea.hbm %s1071_s0, 256 }
   0x3   :  { %s16_s13 = sshll.u32 %s874_s12, 4  ;;  %p815_p0 = scmp.ne.s32.totalorder %s1071_s0, %s814_s16  ;;  %s17_s13 = int_to_ptr.vmem [resolvable:$true] %s16_s13 }
   0x4   :  { %p818_p1 = scmp.lt.u32.totalorder %s814_s16, %s1071_s0 }
   0x6   :  { %p820_p2 = pnand %p818_p1, %p815_p0 }
   0x8   :  { %823 = shalt.err (!%p820_p2)
}
   0x9   :  { %s824_s21 = scalar_lea.vmem %s17_s13, 256  ;;  %p829_p4 = scmp.lt.s32.totalorder %s17_s13, %s17_s13 }
   0xa   :  { %p825_p3 = scmp.ne.s32.totalorder %s17_s13, %s824_s21  ;;  %p830_p5 = scmp.lt.s32.totalorder %s824_s21, %s824_s21 }
   0xc   :  { %p831_p6 = por %p830_p5, %p829_p4 }
   0xe   :  { %p832_p7 = pnand %p831_p6, %p825_p3 }
  0x10   :  { %835 = shalt.err (!%p832_p7)
}
  0x11   :  { %s875_s22 = smov 128   ;;  %s876_s23 = smov 8  }
  0x12   :  { %22 = dma.hbm_to_vmem [thread:$0]  %s1071_s0, 256, %s17_s13, [#allocation4], %s875_s22, %s875_s22, %s876_s23  }
  0x13   :  { %s877_s26 = smov [#allocation6]   ;;  %s836_s30 = scalar_lea.hbm %s1072_s1, 512 }
  0x14   :  { %s28_s27 = sshll.u32 %s877_s26, 4  ;;  %p837_p8 = scmp.ne.s32.totalorder %s1072_s1, %s836_s30  ;;  %s29_s27 = int_to_ptr.vmem [resolvable:$true] %s28_s27 }
  0x15   :  { %p840_p9 = scmp.lt.u32.totalorder %s836_s30, %s1072_s1 }
  0x17   :  { %p842_p10 = pnand %p840_p9, %p837_p8 }
  0x19   :  { %845 = shalt.err (!%p842_p10)
}
  0x1a   :  { %s846_s8 = scalar_lea.vmem %s29_s27, 512  ;;  %p851_p12 = scmp.lt.s32.totalorder %s29_s27, %s29_s27 }
  0x1b   :  { %p847_p11 = scmp.ne.s32.totalorder %s29_s27, %s846_s8  ;;  %p852_p13 = scmp.lt.s32.totalorder %s846_s8, %s846_s8 }
  0x1d   :  { %p853_p0 = por %p852_p13, %p851_p12 }
  0x1f   :  { %p854_p1 = pnand %p853_p0, %p847_p11 }
  0x21   :  { %857 = shalt.err (!%p854_p1)
}
  0x22   :  { %34 = dma.hbm_to_vmem [thread:$0]  %s1072_s1, 512, %s29_s27, [#allocation7], %s875_s22, %s875_s22, %s876_s23  }
  0x23   :  { %868 = dma.done.wait [#allocation4], 256  }
  0x24   :  { %869 = vsyncadd [#allocation4], 4294967040 }
  0x25   :  { %870 = dma.done.wait [#allocation7], 512  }
  0x26   :  { %871 = vsyncadd [#allocation7], 4294966784  ;;  %vm59_vm0 = vcmask 261120   ;;  %v55_v0 = vld [vmem:[#allocation6] sm:$0xff]  ;;  %v56_v1 = vld [vmem:[#allocation6 + $0x8] sm:$0xff]  ;;  %v141_v8 = vlaneseq  ;;  %v878_v25 = vmov 0  }
  0x27   :  { %v57_v2 = vld [vmem:[#allocation6 + $0x10] sm:$0xff]  ;;  %v775_v3 = vpack.c.bf16 %v56_v1, %v55_v0  ;;  %v58_v4 = vld [vmem:[#allocation6 + $0x18] sm:$0xff]  ;;  %800 = vset.pattern.permute.xlu0 %v878_v25  ;;  %801 = vset.pattern.permute.xlu1 %v878_v25  ;;  %v879_v27 = vmov 1966171168   ;;  %v880_v32 = vmov 0.0   ;;  %vm209_vm7 = vcmask 58368  }
  0x28   :  { %v53_v5 = vld [vmem:[#allocation3] sm:$0xff]  ;;  %v779_v6 = vpack.c.bf16 %v58_v4, %v57_v2  ;;  %v54_v7 = vld [vmem:[#allocation3 + $0x8] sm:$0xff]  ;;  %v927_v9 = vand.u32 127, %v141_v8  ;;  %v930_v13 = vshrl.u32 %v141_v8, 7  ;;  %v195_v28 = vunpack.c.l.s4 %v879_v27  ;;  %s881_s16 = smov 1.0   ;;  %s858_s22 = scalar_lea.hbm %s1074_s3, 16 }
  0x29   :  { %772 = vmatprep.mubr.msk.f32.mxu0 %vm59_vm0, %v53_v5  ;;  %776 = vmatprep.subr.bf16.mxu0 %v775_v3  ;;  %vm448_vm8 = vcmask 1024   ;;  %p859_p2 = scmp.ne.s32.totalorder %s1074_s3, %s858_s22  ;;  %p862_p3 = scmp.lt.u32.totalorder %s858_s22, %s1074_s3 }
  0x2a   :  { %778 = vmatpush3.bf16.msra.mxu0 %v775_v3  ;;  %vm145_vm1 = vcmp.lt.s32.totalorder %v927_v9, 8  ;;  %vm168_vm2 = vcmp.eq.s32.totalorder %v927_v9, %v930_v13  ;;  %v942_v29 = vsub.s32 0, %v930_v13  ;;  %v945_v30 = vsub.s32 1, %v930_v13 }
  0x2b   :  { %780 = vmatprep.subr.bf16.mxu0 %v779_v6  ;;  %v948_v31 = vsub.s32 2, %v930_v13  ;;  %v952_v34 = vsub.s32 3, %v930_v13  ;;  %v955_v35 = vsub.s32 4, %v930_v13  ;;  %v958_v36 = vsub.s32 5, %v930_v13  ;;  %p864_p4 = pnand %p862_p3, %p859_p2 }
  0x2c   :  { %v961_v38 = vsub.s32 6, %v930_v13  ;;  %v964_v39 = vsub.s32 7, %v930_v13  ;;  %v196_v40 = vunpack.c.0.s8 %v195_v28 }
  0x2e   :  { %782 = vmatpush3.bf16.msra.mxu0 %v779_v6  ;;  %v975_v50 = vsub.s32 %v196_v40, %v930_v13 }
  0x31   :  { %773 = vmatmul.mubr.msk.f32.vlgmr.msra.gmra.mrb[0].mxu0 %vm59_vm0, %v54_v7 }
 0x104   :  { %v774_v10 = vpop.f32.mrb[0].mxu0 }
 0x105   :  { %v132_v11 = vpop.f32.mrb[1].mxu0  ;;  %v147_v14 = vsel %vm145_vm1, %v774_v10, -1e+30 }
 0x106   :  { %v146_v12 = vsel %vm145_vm1, %v132_v11, -1e+30  ;;  %v170_v24 = vsel %vm168_vm2, %v147_v14, 0.0 }
 0x107   :  { %148 = vmax.xlane.f32.xlu0 %v146_v12  ;;  %v169_v15 = vsel %vm168_vm2, %v146_v12, 0.0 }
 0x10b   :  { %150 = vmax.xlane.f32.xlu0 %v147_v14 }
 0x10f   :  { %171 = vadd.xlane.f32.xlu0 %v169_v15 }
 0x194   :  { %v934_v16 = vpop.xlane.xlu0 %148 }
 0x195   :  { %v152_v17 = vsub.f32 %v146_v12, %v934_v16 }
 0x197   :  { %v154_v18 = vmul.f32 1.442695, %v152_v17 }
 0x198   :  { %v937_v19 = vpop.xlane.xlu0 %150 }
 0x199   :  { %v153_v20 = vsub.f32 %v147_v14, %v937_v19  ;;  %802 = vpow2.f32 %v154_v18 }
 0x19b   :  { %v156_v21 = vmul.f32 1.442695, %v153_v20 }
 0x19c   :  { %v172_v26 = vpop.xlane.xlu0 %171 }
 0x19d   :  { %804 = vpow2.f32 %v156_v21  ;;  %vm177_vm3 = vcmp.ge.f32.partialorder %v172_v26, %v934_v16 }
 0x19e   :  { %v750_v33 = vsel %vm177_vm3, 1.0, %v880_v32 }
 0x19f   :  { %v468_v41 = vrot.slane %v750_v33, %v942_v29  ;;  %v472_v42 = vrot.slane %v750_v33, %v945_v30  ;;  %v476_v43 = vrot.slane %v750_v33, %v948_v31  ;;  %v480_v44 = vrot.slane %v750_v33, %v952_v34 }
 0x1a0   :  { %v484_v45 = vrot.slane %v750_v33, %v955_v35  ;;  %v488_v46 = vrot.slane %v750_v33, %v958_v36  ;;  %v492_v48 = vrot.slane %v750_v33, %v961_v38  ;;  %v496_v49 = vrot.slane %v750_v33, %v964_v39 }
 0x1a1   :  { %v529_v51 = vcombine.low %v468_v41, %v472_v42  ;;  %v530_v52 = vcombine.low %v476_v43, %v480_v44 }
 0x1a2   :  { %v531_v53 = vcombine.low %v484_v45, %v488_v46  ;;  %v532_v55 = vcombine.low %v492_v48, %v496_v49 }
 0x1a3   :  { %v803_v22 = vpop.eup %802  ;;  %v539_v58 = vrot.slane %v529_v51, %v975_v50  ;;  %v546_v59 = vrot.slane %v530_v52, %v975_v50 }
 0x1a4   :  { %158 = vadd.xlane.f32.xlu1 %v803_v22  ;;  %v553_v60 = vrot.slane %v531_v53, %v975_v50  ;;  %v560_v62 = vrot.slane %v532_v55, %v975_v50 }
 0x1a5   :  { %v990_v7 = vcombine.low %v539_v58, %v546_v59 }
 0x1a6   :  { %v562_v14 = vcombine.low %v553_v60, %v560_v62 }
 0x1a7   :  { %v805_v23 = vpop.eup %804 }
 0x1a8   :  { %160 = vadd.xlane.f32.xlu1 %v805_v23 }
 0x1ac   :  { %173 = vadd.xlane.f32.xlu1 %v170_v24 }
 0x231   :  { %v159_v37 = vpop.xlane.xlu1 %158 }
 0x232   :  { %806 = vlog2.f32 %v159_v37 }
 0x235   :  { %v161_v47 = vpop.xlane.xlu1 %160 }
 0x236   :  { %808 = vlog2.f32 %v161_v47 }
 0x239   :  { %v174_v54 = vpop.xlane.xlu1 %173 }
 0x23a   :  { %vm178_vm4 = vcmp.ge.f32.partialorder %v174_v54, %v937_v19 }
 0x23b   :  { %v751_v56 = vsel %vm178_vm4, 1.0, %v880_v32 }
 0x23c   :  { %v807_v57 = vpop.eup %806  ;;  %v500_v63 = vrot.slane %v751_v56, %v942_v29  ;;  %v504_v0 = vrot.slane %v751_v56, %v945_v30  ;;  %v508_v1 = vrot.slane %v751_v56, %v948_v31  ;;  %v512_v2 = vrot.slane %v751_v56, %v952_v34 }
 0x23d   :  { %v163_v61 = vmul.f32 0.6931472, %v807_v57  ;;  %v516_v3 = vrot.slane %v751_v56, %v955_v35  ;;  %v520_v4 = vrot.slane %v751_v56, %v958_v36  ;;  %v524_v11 = vrot.slane %v751_v56, %v961_v38 }
 0x23e   :  { %v528_v12 = vrot.slane %v751_v56, %v964_v39  ;;  %v578_v15 = vcombine.low %v500_v63, %v504_v0  ;;  %v579_v17 = vcombine.low %v508_v1, %v512_v2  ;;  %v569_v0 = vrot.slane %v990_v7, %v975_v50 }
 0x23f   :  { %v166_v5 = vadd.f32 %v163_v61, %v934_v16  ;;  %v580_v18 = vcombine.low %v516_v3, %v520_v4  ;;  %v576_v2 = vrot.slane %v562_v14, %v975_v50  ;;  %v183_v14 = vld [vmem:[%s1073_s2] sm:$0x1] }
 0x240   :  { %v809_v6 = vpop.eup %808  ;;  %v581_v37 = vcombine.low %v524_v11, %v528_v12  ;;  %v588_v41 = vrot.slane %v578_v15, %v975_v50  ;;  %v595_v42 = vrot.slane %v579_v17, %v975_v50  ;;  %v184_v17 = vld [vmem:[%s1073_s2 + $0x1] sm:$0x1]  ;;  %vm185_vm5 = vcmp.gt.f32.partialorder %v183_v14, 0.0 }
 0x241   :  { %v175_v8 = vsub.f32 %v166_v5, %v172_v26  ;;  %v165_v10 = vmul.f32 0.6931472, %v809_v6  ;;  %v602_v60 = vrot.slane %v580_v18, %v975_v50  ;;  %vm186_vm6 = vcmp.gt.f32.partialorder %v184_v17, 0.0 }
 0x242   :  { %v610_v3 = vcombine.low %v588_v41, %v595_v42  ;;  %v752_v18 = vsel %vm185_vm5, 1.0, %v880_v32 }
 0x243   :  { %v167_v20 = vadd.f32 %v165_v10, %v937_v19  ;;  %v218_v21 = vrot.slane %v175_v8, %v942_v29  ;;  %v222_v22 = vrot.slane %v175_v8, %v945_v30  ;;  %v226_v16 = vrot.slane %v175_v8, %v948_v31 }
 0x244   :  { %v230_v23 = vrot.slane %v175_v8, %v952_v34  ;;  %v234_v24 = vrot.slane %v175_v8, %v955_v35  ;;  %v238_v25 = vrot.slane %v175_v8, %v958_v36  ;;  %v242_v26 = vrot.slane %v175_v8, %v961_v38 }
 0x245   :  { %v176_v27 = vsub.f32 %v167_v20, %v174_v54  ;;  %v246_v28 = vrot.slane %v175_v8, %v964_v39  ;;  %v279_v33 = vcombine.low %v218_v21, %v222_v22  ;;  %v577_v10 = vcombine.low %v569_v0, %v576_v2 }
 0x246   :  { %v280_v19 = vcombine.low %v226_v16, %v230_v23  ;;  %v281_v40 = vcombine.low %v234_v24, %v238_v25  ;;  %v618_v11 = vrot.slane %v610_v3, %v975_v50  ;;  %v753_v20 = vsel %vm186_vm6, 1.0, %v880_v32 }
 0x247   :  { %v282_v43 = vcombine.low %v242_v26, %v246_v28  ;;  %v289_v44 = vrot.slane %v279_v33, %v975_v50  ;;  %v250_v45 = vrot.slane %v176_v27, %v942_v29  ;;  %v254_v46 = vrot.slane %v176_v27, %v945_v30 }
 0x248   :  { %v296_v47 = vrot.slane %v280_v19, %v975_v50  ;;  %v303_v48 = vrot.slane %v281_v40, %v975_v50  ;;  %v258_v49 = vrot.slane %v176_v27, %v948_v31  ;;  %v262_v51 = vrot.slane %v176_v27, %v952_v34 }
 0x249   :  { %v310_v52 = vrot.slane %v282_v43, %v975_v50  ;;  %v266_v53 = vrot.slane %v176_v27, %v955_v35  ;;  %v270_v54 = vrot.slane %v176_v27, %v958_v36  ;;  %v274_v55 = vrot.slane %v176_v27, %v961_v38 }
 0x24a   :  { %v311_v56 = vcombine.low %v289_v44, %v296_v47  ;;  %v278_v29 = vrot.slane %v176_v27, %v964_v39  ;;  %v328_v30 = vcombine.low %v250_v45, %v254_v46  ;;  %v329_v57 = vcombine.low %v258_v49, %v262_v51 }
 0x24b   :  { %v312_v58 = vcombine.low %v303_v48, %v310_v52  ;;  %v330_v59 = vcombine.low %v266_v53, %v270_v54  ;;  %v609_v31 = vrot.slane %v581_v37, %v975_v50  ;;  %v193_v21 = vcombine.low %v752_v18, %v753_v20 }
 0x24c   :  { %v319_v34 = vrot.slane %v311_v56, %v975_v50  ;;  %v331_v61 = vcombine.low %v274_v55, %v278_v29  ;;  %v338_v35 = vrot.slane %v328_v30, %v975_v50  ;;  %v345_v36 = vrot.slane %v329_v57, %v975_v50 }
 0x24d   :  { %v326_v38 = vrot.slane %v312_v58, %v975_v50  ;;  %v352_v62 = vrot.slane %v330_v59, %v975_v50  ;;  %v611_v4 = vcombine.low %v602_v60, %v609_v31  ;;  %v200_v22 = vrot.slane %v193_v21, %v975_v50 }
 0x24e   :  { %v359_v39 = vrot.slane %v331_v61, %v975_v50  ;;  %v360_v63 = vcombine.low %v338_v35, %v345_v36  ;;  %v385_v24 = vsub.s32 %v927_v9, %v930_v13 }
 0x24f   :  { %v327_v1 = vcombine.low %v319_v34, %v326_v38  ;;  %v625_v12 = vrot.slane %v611_v4, %v975_v50  ;;  %v207_v16 = vrot.slane %v200_v22, %v975_v50 }
 0x250   :  { %v361_v5 = vcombine.low %v352_v62, %v359_v39  ;;  %v368_v6 = vrot.slane %v360_v63, %v975_v50 }
 0x251   :  { %378 = vperm.xlu0 %800, %v327_v1   ;;  %v626_v7 = vcombine.low %v618_v11, %v625_v12  ;;  %v210_v23 = vsel %vm209_vm7, %v207_v16, 0.0 }
 0x252   :  { %v375_v8 = vrot.slane %v361_v5, %v975_v50 }
 0x254   :  { %v376_v15 = vcombine.low %v368_v6, %v375_v8 }
 0x255   :  { %628 = vperm.xlu0 %800, %v577_v10  }
 0x256   :  { %381 = vperm.xlu1 %801, %v376_v15  }
 0x259   :  { %631 = vperm.xlu0 %800, %v626_v7  }
 0x27a   :  { %211 = vadd.xlane.f32.xlu1 %v210_v23 }
 0x2d0   :  { %v379_v25 = vpop.permute.xlu0 %378 }
 0x2d1   :  { %v386_v26 = vrot.slane %v379_v25, %v385_v24 }
 0x2d3   :  { %v397_v27 = vrot.slane %v386_v26, %v975_v50 }
 0x2d4   :  { %v629_v13 = vpop.permute.xlu0 %628 }
 0x2d5   :  { %v382_v28 = vpop.permute.xlu1 %381  ;;  %v404_v32 = vrot.slane %v397_v27, %v975_v50  ;;  %v636_v47 = vrot.slane %v629_v13, %v385_v24 }
 0x2d6   :  { %v390_v33 = vrot.slane %v382_v28, %v385_v24 }
 0x2d7   :  { %v421_v40 = vmul.f32 %v752_v18, %v404_v32  ;;  %v647_v52 = vrot.slane %v636_v47, %v975_v50 }
 0x2d8   :  { %v411_v37 = vrot.slane %v390_v33, %v975_v50  ;;  %v632_v45 = vpop.permute.xlu0 %631 }
 0x2d9   :  { %v640_v46 = vrot.slane %v632_v45, %v385_v24  ;;  %v654_v54 = vrot.slane %v647_v52, %v975_v50 }
 0x2da   :  { %v418_v19 = vrot.slane %v411_v37, %v975_v50 }
 0x2db   :  { %v661_v48 = vrot.slane %v640_v46, %v975_v50  ;;  %v671_v56 = vmul.f32 %v752_v18, %v654_v54 }
 0x2dc   :  { %v422_v41 = vmul.f32 %v753_v20, %v418_v19 }
 0x2dd   :  { %v668_v53 = vrot.slane %v661_v48, %v975_v50 }
 0x2de   :  { %v425_v42 = vcombine.low %v421_v40, %v422_v41 }
 0x2df   :  { %v672_v55 = vmul.f32 %v753_v20, %v668_v53 }
 0x2e0   :  { %v432_v43 = vrot.slane %v425_v42, %v975_v50 }
 0x2e1   :  { %v675_v29 = vcombine.low %v671_v56, %v672_v55 }
 0x2e2   :  { %v439_v44 = vrot.slane %v432_v43, %v975_v50 }
 0x2e3   :  { %v682_v57 = vrot.slane %v675_v29, %v975_v50 }
 0x2e4   :  { %v441_v9 = vsel %vm209_vm7, %v439_v44, 0.0 }
 0x2e5   :  { %442 = vadd.xlane.f32.xlu0 %v441_v9  ;;  %v689_v31 = vrot.slane %v682_v57, %v975_v50 }
 0x2e7   :  { %v691_v34 = vsel %vm209_vm7, %v689_v31, 0.0 }
 0x307   :  { %v212_v49 = vpop.xlane.xlu1 %211 }
 0x308   :  { %v444_v51 = vmax.f32 %v212_v49, 1.0  ;;  %v705_v61 = vrot.slane %v212_v49, 4 }
 0x30a   :  { %810 = vrcp.f32 %v444_v51  ;;  %v706_v35 = vadd.f32 %v705_v61, %v212_v49 }
 0x30c   :  { %v707_v63 = vrot.slane %v706_v35, 2 }
 0x30e   :  { %v708_v4 = vadd.f32 %v707_v63, %v706_v35 }
 0x310   :  { %v709_v10 = vrot.slane %v708_v4, 1 }
 0x312   :  { %v710_v15 = vadd.f32 %v709_v10, %v708_v4 }
 0x314   :  { %v811_v30 = vpop.eup %810 }
 0x372   :  { %v443_v58 = vpop.xlane.xlu0 %442 }
 0x373   :  { %v446_v59 = vmul.f32 %v811_v30, %v443_v58 }
 0x375   :  { %v449_v60 = vsel %vm448_vm8, %v446_v59, 0.0 }
 0x376   :  { %450 = vadd.xlane.f32.xlu1 %v449_v60 }
 0x37a   :  { %692 = vadd.xlane.f32.xlu1 %v691_v34 }
 0x403   :  { %v451_v36 = vpop.xlane.xlu1 %450 }
 0x404   :  { %v452_v38 = vrot.slane %v451_v36, 4 }
 0x406   :  { %v453_v62 = vadd.f32 %v452_v38, %v451_v36 }
 0x407   :  { %v693_v39 = vpop.xlane.xlu1 %692 }
 0x408   :  { %v454_v0 = vrot.slane %v453_v62, 2  ;;  %v694_v1 = vrot.slane %v693_v39, 4 }
 0x40a   :  { %v695_v2 = vadd.f32 %v694_v1, %v693_v39  ;;  %v455_v3 = vadd.f32 %v454_v0, %v453_v62 }
 0x40c   :  { %v696_v5 = vrot.slane %v695_v2, 2  ;;  %v456_v6 = vrot.slane %v455_v3, 1 }
 0x40e   :  { %v697_v8 = vadd.f32 %v696_v5, %v695_v2  ;;  %v457_v50 = vadd.f32 %v456_v6, %v455_v3 }
 0x410   :  { %783 = vpush %v457_v50  ;;  %v698_v11 = vrot.slane %v697_v8, 1 }
 0x412   :  { %v699_v12 = vadd.f32 %v698_v11, %v697_v8 }
 0x414   :  { %785 = vpush %v699_v12 }
 0x415   :  { %787 = vpush %v710_v15 }
 0x441   :  { %s784_s2 = spop %783 }
 0x442   :  { %s721_s13 = smul.f32 0.5, %s784_s2 }
 0x444   :  { %723 = sst [smem:[#allocation8]] %s721_s13 }
 0x445   :  { %s786_s14 = spop %785 }
 0x446   :  { %s788_s15 = spop %787 }
 0x447   :  { %s726_s17 = smax.f32 %s881_s16, %s788_s15 }
 0x448   :  { %v727_v7 = vstv %s726_s17 }
 0x449   :  { %812 = vrcp.f32 %v727_v7 }
 0x453   :  { %v813_v14 = vpop.eup %812 }
 0x454   :  { %789 = vpush %v813_v14 }
 0x485   :  { %s790_s18 = spop %789 }
 0x486   :  { %s730_s19 = smul.f32 %s790_s18, %s786_s14 }
 0x488   :  { %732 = sst [smem:[#allocation8 + $0x1]] %s730_s19 }
 0x489   :  { %867 = shalt.err (!%p864_p4)
}
 0x48a   :  { %s882_s27 = smov [#allocation8]  }
 0x48b   :  { %740 = dma.smem_to_hbm %s882_s27, 16, %s1074_s3, [#allocation5]  }
 0x48c   :  { %872 = dma.done.wait [#allocation5], 16  }
 0x48d   :  { %873 = vsyncadd [#allocation5], 4294967280 }
 0x48e   :  { %744 = sfence }
 0x48f   :  { %745 = vsyncpa [#allocation4], 1 }
 0x490   :  { %746 = vsyncpa [#allocation7], 1 }
 0x491   :  { %747 = vsyncpa [#allocation5], 1 }

</bundles_post_ra>
